<compile_context>
chip_gen: v7x
topology: tpu7x:2x2x1
jax: 0.10.0
libtpu: 0.0.40
codegen_flags: <defaults>
</compile_context>

<pallas_src>
import jax
import jax.numpy as jnp
from jax.experimental import pallas as pl
from jax.experimental.pallas import tpu as pltpu


def _round_up(x, m):
    return ((x + m - 1) // m) * m


# ----------------------------- Pallas kernel ------------------------------- #

def _affine_kernel(x_ref, w_ref, b_ref, o_ref):
    # x_ref: (Nb, K_pad)   f32  one tile of flattened images
    # w_ref: (K_pad, E_pad) f32 folded conv+fc weight, resident across the grid
    # b_ref: (1, E_pad)    f32  folded bias
    # o_ref: (Nb, E_pad)   f32  lane-dense output tile
    o_ref[...] = (
        jnp.dot(x_ref[...], w_ref[...], preferred_element_type=jnp.float32)
        + b_ref[...]
    )


# ------------------------- weight folding (wrapper) ------------------------- #

def _fold_conv_into_fc(conv_w, conv_b, fc_w, fc_b, H, W):
    """Effective affine map x.reshape(N, H*W) -> (N, E) equal to
    Conv2d(1, C, 3, stride=1, VALID) -> flatten (C, OH, OW order) -> Linear."""
    C = conv_w.shape[0]
    OH, OW = H - 2, W - 2
    hp = jax.lax.Precision.HIGHEST
    # Conv response (no bias) of the H*W canonical basis images -> (H*W, F),
    # where F = C*OH*OW in PyTorch x.view(N, -1) flatten order.
    eye_imgs = jnp.eye(H * W, dtype=jnp.float32).reshape(H * W, 1, H, W)
    w_conv = jax.lax.conv_general_dilated(
        eye_imgs, conv_w.astype(jnp.float32),
        window_strides=(1, 1), padding="VALID",
        dimension_numbers=("NCHW", "OIHW", "NCHW"),
        precision=hp,
    ).reshape(H * W, C * OH * OW)
    fc_w32 = fc_w.astype(jnp.float32)
    w_eff = jnp.dot(w_conv, fc_w32.T, precision=hp)                  # (H*W, E)
    conv_b_flat = jnp.repeat(conv_b.astype(jnp.float32), OH * OW)    # (F,)
    b_eff = fc_b.astype(jnp.float32) + jnp.dot(fc_w32, conv_b_flat, precision=hp)
    return w_eff, b_eff


# ------------------------------ JAX wrapper -------------------------------- #

def encoder_cnn_forward(x_3d, conv_w, conv_b, fc_w, fc_b, *, n_tile=512):
    """x_3d: (B, T, 1, H, W).  conv_w: (C, 1, 3, 3), conv_b: (C,),
    fc_w: (E, C*(H-2)*(W-2)), fc_b: (E,)  (PyTorch layouts).  Returns (B, T, E)."""
    B, T, _, H, W = x_3d.shape
    E = fc_w.shape[0]
    N = B * T
    K = H * W

    w_eff, b_eff = _fold_conv_into_fc(conv_w, conv_b, fc_w, fc_b, H, W)

    # Lane-/sublane-aligned padded shapes (zero padding -> padded rows/cols
    # contribute nothing and are sliced off at the end).
    K_pad = _round_up(K, 128)
    E_pad = _round_up(E, 128)           # lane-dense output stores (E=32 -> 128)
    # Row-tile: as big as useful but never bigger than the (8-aligned) problem.
    # At Nb=512: x tile 512*K_pad*4 B, out tile 512*E_pad*4 B; with double
    # buffering + resident weights this stays well inside even v7x's 32 MiB
    # scoped-VMEM default for realistic H, W.
    Nb = min(n_tile, _round_up(N, 8))
    N_pad = _round_up(N, Nb)

    x_flat = x_3d.reshape(N, K).astype(jnp.float32)
    x_p = jnp.pad(x_flat, ((0, N_pad - N), (0, K_pad - K)))
    w_p = jnp.pad(w_eff, ((0, K_pad - K), (0, E_pad - E)))
    b_p = jnp.pad(b_eff, (0, E_pad - E)).reshape(1, E_pad)

    out_p = pl.pallas_call(
        _affine_kernel,
        out_shape=jax.ShapeDtypeStruct((N_pad, E_pad), jnp.float32),
        grid=(N_pad // Nb,),
        in_specs=[
            pl.BlockSpec((Nb, K_pad), lambda i: (i, 0)),
            pl.BlockSpec((K_pad, E_pad), lambda i: (0, 0)),  # weights stay resident
            pl.BlockSpec((1, E_pad), lambda i: (0, 0)),
        ],
        out_specs=pl.BlockSpec((Nb, E_pad), lambda i: (i, 0)),
        compiler_params=pltpu.CompilerParams(
            dimension_semantics=("parallel",)),
    )(x_p, w_p, b_p)

    return out_p[:N, :E].reshape(B, T, E)


# ------------------------------ reference ---------------------------------- #

def encoder_cnn_reference(x_3d, conv_w, conv_b, fc_w, fc_b):
    B, T, _, H, W = x_3d.shape
    N = B * T
    E = fc_w.shape[0]
    x = x_3d.reshape(N, 1, H, W).astype(jnp.float32)
    conv = jax.lax.conv_general_dilated(
        x, conv_w, window_strides=(1, 1), padding="VALID",
        dimension_numbers=("NCHW", "OIHW", "NCHW"),
    ) + conv_b[None, :, None, None]
    feats = conv.reshape(N, -1)
    out = feats @ fc_w.T + fc_b[None, :]
    return out.reshape(B, T, E)


# --------------------------------- main ------------------------------------ #

if __name__ == "__main__":
    # Small shapes consistent with the module:
    B, T = 2, 3
    img_x = img_y = 16          # H, W
    cnn_out = 4                 # conv output channels
    cnn_embed = 32              # fc output dim

    key = jax.random.PRNGKey(0)
    k1, k2, k3, k4, k5 = jax.random.split(key, 5)

    x_3d = jax.random.normal(k1, (B, T, 1, img_x, img_y), dtype=jnp.float32)

    F = cnn_out * (img_x - 2) * (img_y - 2)
    conv_w = jax.random.normal(k2, (cnn_out, 1, 3, 3), dtype=jnp.float32) * 0.1
    conv_b = jax.random.normal(k3, (cnn_out,), dtype=jnp.float32) * 0.1
    fc_w = jax.random.normal(k4, (cnn_embed, F), dtype=jnp.float32) * 0.02
    fc_b = jax.random.normal(k5, (cnn_embed,), dtype=jnp.float32) * 0.1

    # jit the whole wrapper so the weight folding, padding and pallas_call are
    # fused into a single XLA executable (one launch path, no host round-trips).
    fwd = jax.jit(encoder_cnn_forward)
    out = fwd(x_3d, conv_w, conv_b, fc_w, fc_b)
    out = jax.block_until_ready(out)

    ref = encoder_cnn_reference(x_3d, conv_w, conv_b, fc_w, fc_b)
    assert out.shape == (B, T, cnn_embed), out.shape
    assert jnp.allclose(out, ref, atol=1e-3, rtol=1e-3), (
        float(jnp.max(jnp.abs(out - ref))))

    print("KERNEL_OK")
</pallas_src>

<mosaic_0001>
module attributes {stable_mosaic.version = 11 : i64} {
  func.func @_affine_kernel(%arg0: i32, %arg1: memref<8x256xf32, #tpu.memory_space<vmem>>, %arg2: memref<256x128xf32, #tpu.memory_space<vmem>>, %arg3: memref<1x128xf32, #tpu.memory_space<vmem>>, %arg4: memref<8x128xf32, #tpu.memory_space<vmem>>) attributes {dimension_semantics = [#tpu.dimension_semantics<parallel>], iteration_bounds = array<i64: 1>, scalar_prefetch = 0 : i64, scratch_operands = 0 : i64, tpu.core_type = #tpu.core_type<tc>, window_params = [{transform_indices = @transform_0, window_bounds = array<i64: 8, 256>}, {pipeline_mode = #tpu.pipeline_mode<synchronous>, transform_indices = @transform_1, window_bounds = array<i64: 256, 128>}, {pipeline_mode = #tpu.pipeline_mode<synchronous>, transform_indices = @transform_2, window_bounds = array<i64: 1, 128>}, {transform_indices = @transform_3, window_bounds = array<i64: 8, 128>}]} {
    %c0 = arith.constant 0 : index
    %c0_0 = arith.constant 0 : index
    %0 = vector.load %arg1[%c0, %c0_0] : memref<8x256xf32, #tpu.memory_space<vmem>>, vector<8x256xf32>
    %c0_1 = arith.constant 0 : index
    %c0_2 = arith.constant 0 : index
    %1 = vector.load %arg2[%c0_1, %c0_2] : memref<256x128xf32, #tpu.memory_space<vmem>>, vector<256x128xf32>
    %cst = arith.constant dense<0.000000e+00> : vector<8x128xf32>
    %2 = tpu.matmul %0, %1, %cst {dimension_numbers = #tpu.dot_dimension_numbers<[1], [0], [0], [1], [0, 0, 1, 1], [], []>} : vector<8x256xf32>, vector<256x128xf32>, vector<8x128xf32> -> vector<8x128xf32>
    %c0_3 = arith.constant 0 : index
    %c0_4 = arith.constant 0 : index
    %3 = vector.load %arg3[%c0_3, %c0_4] : memref<1x128xf32, #tpu.memory_space<vmem>>, vector<1x128xf32>
    %4 = vector.broadcast %3 : vector<1x128xf32> to vector<8x128xf32>
    %5 = arith.addf %2, %4 : vector<8x128xf32>
    %c0_5 = arith.constant 0 : index
    %c0_6 = arith.constant 0 : index
    %6 = vector.load %arg4[%c0_5, %c0_6] : memref<8x128xf32, #tpu.memory_space<vmem>>, vector<8x128xf32>
    tpu.vector_store %arg4[%c0_5, %c0_6], %5 {strides = array<i32>} : memref<8x128xf32, #tpu.memory_space<vmem>>, vector<8x128xf32>,
    return
  }
  func.func @transform_0(%arg0: i32) -> (i32, i32) {
    %c0_i32 = arith.constant 0 : i32
    %c0_i32_0 = arith.constant 0 : i32
    return %arg0, %c0_i32 : i32, i32
  }
  func.func @transform_1(%arg0: i32) -> (i32, i32) {
    %c0_i32 = arith.constant 0 : i32
    %c0_i32_0 = arith.constant 0 : i32
    %c0_i32_1 = arith.constant 0 : i32
    return %c0_i32, %c0_i32_0 : i32, i32
  }
  func.func @transform_2(%arg0: i32) -> (i32, i32) {
    %c0_i32 = arith.constant 0 : i32
    %c0_i32_0 = arith.constant 0 : i32
    %c0_i32_1 = arith.constant 0 : i32
    return %c0_i32, %c0_i32_0 : i32, i32
  }
  func.func @transform_3(%arg0: i32) -> (i32, i32) {
    %c0_i32 = arith.constant 0 : i32
    %c0_i32_0 = arith.constant 0 : i32
    return %arg0, %c0_i32 : i32, i32
  }
}

</mosaic_0001>

<bundles_post_ra>
// kernel: encoder_cnn_forward.1
= control target key start
LH: loop header
LB: loop body
LE: loop exit
PB: predicated region body
PF: predicated region fallthrough
CT: control target
= control target key end

     0   :  { %s326_s1 = inlined_call_operand.vmem [shape: f32[256,128], index: 1, kind: input, shape index: {}]   ;;  %s327_s0 = inlined_call_operand.vmem [shape: f32[8,256], index: 0, kind: input, shape index: {}]   ;;  %s328_s2 = inlined_call_operand.vmem [shape: f32[1,128], index: 2, kind: input, shape index: {}]   ;;  %s329_s3 = inlined_call_operand.vmem [shape: f32[8,128], index: 3, kind: output, shape index: {}]  }
   0x1   :  { %v32_v0 = vld [vmem:[%s326_s1 + $0x80] sm:$0xff]  ;;  %v33_v1 = vld [vmem:[%s326_s1 + $0x88] sm:$0xff]  ;;  %v34_v5 = vld [vmem:[%s326_s1 + $0x90] sm:$0xff] }
   0x2   :  { %v16_v2 = vld [vmem:[%s326_s1] sm:$0xff]  ;;  %v166_v3 = vpack.c.bf16 %v33_v1, %v32_v0  ;;  %v17_v4 = vld [vmem:[%s326_s1 + $0x8] sm:$0xff]  ;;  %v35_v6 = vld [vmem:[%s326_s1 + $0x98] sm:$0xff] }
   0x3   :  { %v168_v7 = vpack.c.bf16 %v17_v4, %v16_v2  ;;  %v170_v8 = vpack.c.bf16 %v35_v6, %v34_v5  ;;  %v18_v9 = vld [vmem:[%s326_s1 + $0x10] sm:$0xff]  ;;  %v19_v10 = vld [vmem:[%s326_s1 + $0x18] sm:$0xff]  ;;  %v36_v11 = vld [vmem:[%s326_s1 + $0xa0] sm:$0xff] }
   0x4   :  { %167 = vmatprep.subr.bf16.mxu0 %v166_v3  ;;  %v37_v12 = vld [vmem:[%s326_s1 + $0xa8] sm:$0xff]  ;;  %v172_v13 = vpack.c.bf16 %v19_v10, %v18_v9  ;;  %v20_v15 = vld [vmem:[%s326_s1 + $0x20] sm:$0xff]  ;;  %v38_v17 = vld [vmem:[%s326_s1 + $0xb0] sm:$0xff] }
   0x5   :  { %169 = vmatpush3.bf16.msra.mxu0 %v168_v7  ;;  %v174_v14 = vpack.c.bf16 %v37_v12, %v36_v11  ;;  %v21_v16 = vld [vmem:[%s326_s1 + $0x28] sm:$0xff]  ;;  %v39_v18 = vld [vmem:[%s326_s1 + $0xb8] sm:$0xff]  ;;  %v22_v21 = vld [vmem:[%s326_s1 + $0x30] sm:$0xff] }
   0x6   :  { %171 = vmatprep.subr.bf16.mxu0 %v170_v8  ;;  %v176_v19 = vpack.c.bf16 %v21_v16, %v20_v15  ;;  %v178_v20 = vpack.c.bf16 %v39_v18, %v38_v17  ;;  %v23_v22 = vld [vmem:[%s326_s1 + $0x38] sm:$0xff]  ;;  %v40_v23 = vld [vmem:[%s326_s1 + $0xc0] sm:$0xff]  ;;  %v41_v24 = vld [vmem:[%s326_s1 + $0xc8] sm:$0xff] }
   0x7   :  { %v15_v25 = vld [vmem:[%s327_s0 + $0x8] sm:$0xff]  ;;  %v180_v26 = vpack.c.bf16 %v23_v22, %v22_v21  ;;  %v182_v27 = vpack.c.bf16 %v41_v24, %v40_v23  ;;  %v24_v28 = vld [vmem:[%s326_s1 + $0x40] sm:$0xff]  ;;  %v42_v30 = vld [vmem:[%s326_s1 + $0xd0] sm:$0xff] }
   0x8   :  { %119 = vmatprep.mubr.f32.mxu0 %v15_v25  ;;  %v25_v29 = vld [vmem:[%s326_s1 + $0x48] sm:$0xff]  ;;  %v43_v31 = vld [vmem:[%s326_s1 + $0xd8] sm:$0xff]  ;;  %v26_v34 = vld [vmem:[%s326_s1 + $0x50] sm:$0xff] }
   0x9   :  { %173 = vmatpush3.bf16.msra.mxu0 %v172_v13  ;;  %v184_v32 = vpack.c.bf16 %v25_v29, %v24_v28  ;;  %v186_v33 = vpack.c.bf16 %v43_v31, %v42_v30  ;;  %v27_v35 = vld [vmem:[%s326_s1 + $0x58] sm:$0xff]  ;;  %v44_v36 = vld [vmem:[%s326_s1 + $0xe0] sm:$0xff]  ;;  %v45_v37 = vld [vmem:[%s326_s1 + $0xe8] sm:$0xff] }
   0xa   :  { %175 = vmatprep.subr.bf16.mxu0 %v174_v14  ;;  %v188_v38 = vpack.c.bf16 %v27_v35, %v26_v34  ;;  %v190_v39 = vpack.c.bf16 %v45_v37, %v44_v36  ;;  %v28_v40 = vld [vmem:[%s326_s1 + $0x60] sm:$0xff]  ;;  %v29_v41 = vld [vmem:[%s326_s1 + $0x68] sm:$0xff]  ;;  %v46_v42 = vld [vmem:[%s326_s1 + $0xf0] sm:$0xff] }
   0xb   :  { %v47_v43 = vld [vmem:[%s326_s1 + $0xf8] sm:$0xff]  ;;  %v192_v44 = vpack.c.bf16 %v29_v41, %v28_v40  ;;  %v30_v46 = vld [vmem:[%s326_s1 + $0x70] sm:$0xff]  ;;  %v14_v49 = vld [vmem:[%s327_s0] sm:$0xff] }
   0xc   :  { %v194_v45 = vpack.c.bf16 %v47_v43, %v46_v42  ;;  %v31_v47 = vld [vmem:[%s326_s1 + $0x78] sm:$0xff]  ;;  %v130_v51 = vld [vmem:[%s328_s2] ss:$0 sm:$0xff] }
   0xd   :  { %177 = vmatpush3.bf16.msra.mxu0 %v176_v19  ;;  %v196_v48 = vpack.c.bf16 %v31_v47, %v30_v46 }
   0xe   :  { %179 = vmatprep.subr.bf16.mxu0 %v178_v20 }
  0x11   :  { %181 = vmatpush3.bf16.msra.mxu0 %v180_v26 }
  0x12   :  { %183 = vmatprep.subr.bf16.mxu0 %v182_v27 }
  0x15   :  { %185 = vmatpush3.bf16.msra.mxu0 %v184_v32 }
  0x16   :  { %187 = vmatprep.subr.bf16.mxu0 %v186_v33 }
  0x19   :  { %189 = vmatpush3.bf16.msra.mxu0 %v188_v38 }
  0x1a   :  { %191 = vmatprep.subr.bf16.mxu0 %v190_v39 }
  0x1d   :  { %193 = vmatpush3.bf16.msra.mxu0 %v192_v44 }
  0x1e   :  { %195 = vmatprep.subr.bf16.mxu0 %v194_v45 }
  0x21   :  { %197 = vmatpush3.bf16.msra.mxu0 %v196_v48 }
  0x24   :  { %120 = vmatmul.mubr.f32.vlgmr.msra.gmra.mrb[0].mxu0 %v14_v49 }
  0xf7   :  { %v163_v50 = vpop.f32.mrb[0].mxu0 }
  0xf8   :  { %v164_v52 = vpop.f32.mrb[1].mxu0 }
  0xf9   :  { %v165_v53 = vadd.f32 %v164_v52, %v163_v50 }
  0xfb   :  { %v122_v54 = vadd.f32 %v165_v53, %v130_v51 }
  0xfd   :  { %125 = vst [vmem:[%s329_s3] sm:$0xff] %v122_v54 }

</bundles_post_ra>
